<compile_context>
chip_gen: v5e
topology: v5e:2x2
jax: 0.10.0
libtpu: 0.0.40
codegen_flags: <defaults>
</compile_context>

<pallas_src>
import functools

import jax
import jax.numpy as jnp
from jax.experimental import pallas as pl
from jax.experimental.pallas import tpu as pltpu


def _round_up(v, m):
    return (v + m - 1) // m * m


def _round_down(v, m):
    return (v // m) * m


# ---------------------------------------------------------------------------
# Pallas kernel
# ---------------------------------------------------------------------------

def _patch_embed_kernel(x_ref, w_ref, b_ref, *rest, with_norm, eps=1e-5):
    """One row-tile of patches: (tm, C*P)@(C*P, E) + bias [+ fused LayerNorm(E)].

    x_ref / w_ref arrive already in the MXU compute dtype (bf16); accumulation and
    all elementwise / LayerNorm math are f32; the store casts to the output dtype.
    """
    o_ref = rest[-1]
    y = jnp.dot(x_ref[...], w_ref[...],
                preferred_element_type=jnp.float32)       # (tm, E) f32 accumulate
    y = y + b_ref[...]                                    # (1, E) f32 broadcast
    if with_norm:
        g_ref, beta_ref = rest[0], rest[1]
        inv_e = jnp.float32(1.0 / y.shape[-1])
        mu = jnp.sum(y, axis=-1, keepdims=True) * inv_e
        ms = jnp.sum(y * y, axis=-1, keepdims=True) * inv_e
        var = ms - mu * mu                                # one-pass stats
        y = (y - mu) * jax.lax.rsqrt(var + eps) * g_ref[...] + beta_ref[...]
    o_ref[...] = y.astype(o_ref.dtype)


# ---------------------------------------------------------------------------
# Wrapper (pallas_call plumbing)
# ---------------------------------------------------------------------------

def patch_embed(x, conv_w, conv_b, gamma=None, beta=None, *,
                patch_size, row_tile=4096,
                compute_dtype=jnp.bfloat16, out_dtype=jnp.bfloat16, eps=1e-5):
    """x: (B, C_in, N); conv_w: (E, C_in, P) PyTorch Conv1d layout; conv_b: (E,).

    Returns (B, N // P, E) in `out_dtype`, matching PatchEmbed.forward.
    Pass out_dtype=jnp.float32 / compute_dtype=jnp.float32 for strict f32 parity.
    """
    B, C, N = x.shape
    assert N % patch_size == 0, "sequence length must be divisible by patch_size"
    E = conv_w.shape[0]
    assert conv_w.shape == (E, C, patch_size)
    NP = N // patch_size
    K = C * patch_size
    rows = B * NP

    # Cast BEFORE the patch-major rearrange so the materialized transpose moves half
    # the bytes.  Feature order (c, p) matches conv_w[e, c, p] flattened to (K, E).
    xc = x.astype(compute_dtype)
    xp = xc.reshape(B, C, NP, patch_size).transpose(0, 2, 1, 3).reshape(rows, K)
    wp = conv_w.astype(compute_dtype).reshape(E, K).T      # (K, E)
    # (1, E) params stay f32: 512 B of DMA, keeps the f32 accumulation path exact.
    bp = conv_b.astype(jnp.float32).reshape(1, E)

    with_norm = gamma is not None

    # ---- tile-size selection (write-bound kernel: big tiles amortize ~0.35 us/step,
    #      but the x tile is lane-padded K->128 in VMEM, so budget for that).
    cbytes = jnp.dtype(compute_dtype).itemsize
    obytes = jnp.dtype(out_dtype).itemsize
    e_pad = _round_up(E, 128)
    bytes_per_row = 128 * cbytes + e_pad * obytes           # padded x row + out row
    vmem_budget = 12 << 20                                   # per-buffer budget; x2 below
    max_tm = max(8, _round_down(vmem_budget // bytes_per_row, 8))
    tm = min(_round_up(rows, 8), _round_up(row_tile, 8), max_tm)

    # Avoid the jnp.pad / y[:rows] full-array copies when a nearby tm divides rows.
    if rows % 8 == 0 and rows % tm != 0:
        for cand in range(tm, max(tm // 2 - 1, 7), -8):
            if rows % cand == 0:
                tm = cand
                break

    # v7x megacore: ensure >= 2 grid steps when splitting is free (no extra padding).
    if pl.cdiv(rows, tm) < 2 and rows >= 16 and rows % 16 == 0:
        tm = min(tm, rows // 2)

    n_tiles = pl.cdiv(rows, tm)
    rows_pad = n_tiles * tm
    if rows_pad != rows:
        xp = jnp.pad(xp, ((0, rows_pad - rows), (0, 0)))

    weight_args = [wp, bp]
    weight_specs = [pl.BlockSpec((K, E), lambda i: (0, 0)),
                    pl.BlockSpec((1, E), lambda i: (0, 0))]
    if with_norm:
        weight_args += [gamma.astype(jnp.float32).reshape(1, E),
                        beta.astype(jnp.float32).reshape(1, E)]
        weight_specs += [pl.BlockSpec((1, E), lambda i: (0, 0)),
                         pl.BlockSpec((1, E), lambda i: (0, 0))]

    # Double-buffered x + out tiles, plus (tiny) resident weights.
    vmem_est = 2 * tm * bytes_per_row + 2 * (K * e_pad * cbytes + 4 * e_pad * 4) + (64 << 10)
    cp_kwargs = dict(dimension_semantics=("parallel",))
    if vmem_est > (12 << 20):        # only raise past the v5e 16 MiB scoped default
        cp_kwargs["vmem_limit_bytes"] = int(min(2 * vmem_est, 48 << 20))

    kernel = functools.partial(_patch_embed_kernel, with_norm=with_norm, eps=eps)
    y = pl.pallas_call(
        kernel,
        out_shape=jax.ShapeDtypeStruct((rows_pad, E), out_dtype),
        grid=(n_tiles,),
        in_specs=[pl.BlockSpec((tm, K), lambda i: (i, 0))] + weight_specs,
        out_specs=pl.BlockSpec((tm, E), lambda i: (i, 0)),
        compiler_params=pltpu.CompilerParams(**cp_kwargs),
    )(xp, *weight_args)

    if rows_pad != rows:
        y = y[:rows]
    return y.reshape(B, NP, E)


# ---------------------------------------------------------------------------
# Pure-JAX reference (for correctness check only)
# ---------------------------------------------------------------------------

def _reference(x, conv_w, conv_b, gamma=None, beta=None, *, patch_size, eps=1e-5):
    B, C, N = x.shape
    NP = N // patch_size
    xp = x.reshape(B, C, NP, patch_size)
    y = jnp.einsum('bcnp,ecp->bne', xp, conv_w) + conv_b
    if gamma is not None:
        mu = y.mean(-1, keepdims=True)
        var = ((y - mu) ** 2).mean(-1, keepdims=True)
        y = (y - mu) / jnp.sqrt(var + eps) * gamma + beta
    return y


# ---------------------------------------------------------------------------

if __name__ == "__main__":
    # Small config consistent with the module:
    #   B=2, in_chans=4, N=256 healpix pixels, patch_size=4 (% 4 == 0), embed_dim=128.
    #   -> num_patches = 64, matmul rows = B*NP = 128 (split into 2 tiles of 64 for
    #      the v7x megacore), lane-dense output (E = 128).
    B, C_in, N = 2, 4, 256
    patch_size = 4
    embed_dim = 128

    key = jax.random.PRNGKey(0)
    kx, kw, kb = jax.random.split(key, 3)
    x = jax.random.normal(kx, (B, C_in, N), jnp.float32)
    # PyTorch Conv1d weight layout: (out_channels, in_channels, kernel_size)
    conv_w = 0.05 * jax.random.normal(kw, (embed_dim, C_in, patch_size), jnp.float32)
    conv_b = 0.02 * jax.random.normal(kb, (embed_dim,), jnp.float32)
    gamma = jnp.ones((embed_dim,), jnp.float32)
    beta = jnp.zeros((embed_dim,), jnp.float32)

    fwd_bf16 = jax.jit(functools.partial(patch_embed, patch_size=patch_size))
    fwd_f32 = jax.jit(functools.partial(patch_embed, patch_size=patch_size,
                                        out_dtype=jnp.float32))

    y = fwd_bf16(x, conv_w, conv_b)                    # default config: norm = None
    y_norm = fwd_f32(x, conv_w, conv_b, gamma, beta)   # patch_embed_norm_layer = LayerNorm
    jax.block_until_ready((y, y_norm))

    ref = _reference(x, conv_w, conv_b, patch_size=patch_size)
    ref_n = _reference(x, conv_w, conv_b, gamma, beta, patch_size=patch_size)

    assert y.shape == (B, N // patch_size, embed_dim), y.shape
    assert y.dtype == jnp.bfloat16, y.dtype
    assert y_norm.shape == (B, N // patch_size, embed_dim), y_norm.shape
    assert bool(jnp.all(jnp.isfinite(y.astype(jnp.float32))))
    assert bool(jnp.all(jnp.isfinite(y_norm)))
    # bf16 MXU operands / bf16 output + f32 accumulate -> small delta vs f32 reference.
    assert bool(jnp.allclose(y.astype(jnp.float32), ref, atol=5e-2, rtol=5e-2))
    assert bool(jnp.allclose(y_norm, ref_n, atol=5e-2, rtol=5e-2))
    print("KERNEL_OK")
</pallas_src>

<mosaic_0001>
module attributes {stable_mosaic.version = 11 : i64} {
  func.func @_patch_embed_kernel(%arg0: i32, %arg1: memref<64x16xbf16, #tpu.memory_space<vmem>>, %arg2: memref<16x128xbf16, #tpu.memory_space<vmem>>, %arg3: memref<1x128xf32, #tpu.memory_space<vmem>>, %arg4: memref<64x128xbf16, #tpu.memory_space<vmem>>) attributes {dimension_semantics = [#tpu.dimension_semantics<parallel>], iteration_bounds = array<i64: 2>, scalar_prefetch = 0 : i64, scratch_operands = 0 : i64, tpu.core_type = #tpu.core_type<tc>, window_params = [{transform_indices = @transform_0, window_bounds = array<i64: 64, 16>}, {pipeline_mode = #tpu.pipeline_mode<synchronous>, transform_indices = @transform_1, window_bounds = array<i64: 16, 128>}, {pipeline_mode = #tpu.pipeline_mode<synchronous>, transform_indices = @transform_2, window_bounds = array<i64: 1, 128>}, {transform_indices = @transform_3, window_bounds = array<i64: 64, 128>}]} {
    %c0 = arith.constant 0 : index
    %c0_0 = arith.constant 0 : index
    %0 = vector.load %arg1[%c0, %c0_0] : memref<64x16xbf16, #tpu.memory_space<vmem>>, vector<64x16xbf16>
    %c0_1 = arith.constant 0 : index
    %c0_2 = arith.constant 0 : index
    %1 = vector.load %arg2[%c0_1, %c0_2] : memref<16x128xbf16, #tpu.memory_space<vmem>>, vector<16x128xbf16>
    %cst = arith.constant dense<0.000000e+00> : vector<64x128xf32>
    %2 = tpu.matmul %0, %1, %cst {dimension_numbers = #tpu.dot_dimension_numbers<[1], [0], [0], [1], [0, 0, 1, 1], [], []>} : vector<64x16xbf16>, vector<16x128xbf16>, vector<64x128xf32> -> vector<64x128xf32>
    %c0_3 = arith.constant 0 : index
    %c0_4 = arith.constant 0 : index
    %3 = vector.load %arg3[%c0_3, %c0_4] : memref<1x128xf32, #tpu.memory_space<vmem>>, vector<1x128xf32>
    %4 = vector.broadcast %3 : vector<1x128xf32> to vector<64x128xf32>
    %5 = arith.addf %2, %4 : vector<64x128xf32>
    %6 = arith.truncf %5 : vector<64x128xf32> to vector<64x128xbf16>
    %c0_5 = arith.constant 0 : index
    %c0_6 = arith.constant 0 : index
    %7 = vector.load %arg4[%c0_5, %c0_6] : memref<64x128xbf16, #tpu.memory_space<vmem>>, vector<64x128xbf16>
    tpu.vector_store %arg4[%c0_5, %c0_6], %6 {strides = array<i32>} : memref<64x128xbf16, #tpu.memory_space<vmem>>, vector<64x128xbf16>,
    return
  }
  func.func @transform_0(%arg0: i32) -> (i32, i32) {
    %c0_i32 = arith.constant 0 : i32
    %c0_i32_0 = arith.constant 0 : i32
    return %arg0, %c0_i32 : i32, i32
  }
  func.func @transform_1(%arg0: i32) -> (i32, i32) {
    %c0_i32 = arith.constant 0 : i32
    %c0_i32_0 = arith.constant 0 : i32
    %c0_i32_1 = arith.constant 0 : i32
    return %c0_i32, %c0_i32_0 : i32, i32
  }
  func.func @transform_2(%arg0: i32) -> (i32, i32) {
    %c0_i32 = arith.constant 0 : i32
    %c0_i32_0 = arith.constant 0 : i32
    %c0_i32_1 = arith.constant 0 : i32
    return %c0_i32, %c0_i32_0 : i32, i32
  }
  func.func @transform_3(%arg0: i32) -> (i32, i32) {
    %c0_i32 = arith.constant 0 : i32
    %c0_i32_0 = arith.constant 0 : i32
    return %arg0, %c0_i32 : i32, i32
  }
}

</mosaic_0001>

<bundles_post_ra>
// kernel: patch_embed.1
= control target key start
LH: loop header
LB: loop body
LE: loop exit
PB: predicated region body
PF: predicated region fallthrough
CT: control target
= control target key end

     0   :  { %8 = vsyncpa [#allocation3], 0  ;;  %s639_s0 = inlined_call_operand.vmem [shape: bf16[128,16], index: 0, kind: input, shape index: {}]   ;;  %s640_s1 = inlined_call_operand.vmem [shape: bf16[16,128], index: 1, kind: input, shape index: {}]   ;;  %s641_s2 = inlined_call_operand.vmem [shape: f32[1,128], index: 2, kind: input, shape index: {}]   ;;  %s642_s3 = inlined_call_operand.hbm [shape: bf16[128,128], index: 3, kind: output, shape index: {}]  }
   0x1   :  { %10 = vsyncpa [#allocation3 + $0x1], 0  ;;  %s545_s12 = smov 0   ;;  %s547_s13 = smov 0  }
   0x2   :  { %s549_s14 = smov 0   ;;  %s551_s15 = smov 0  }
   0x3 LB: > { %s566_s16 = sadd.s32 4294967295, %s521_s15   ;;  %s349_s17 = sadd.s32 4294967294, %s521_s15   ;;  %s521_s15 = sphi %s551_s15, %s648_s15   ;;  %s517_s14 = sphi %s549_s14, %s647_s14   ;;  %s513_s13 = sphi %s547_s13, %s646_s13   ;;  %s509_s12 = sphi %s545_s12, %s645_s12  }
   0x4   : > { %s570_s18 = sadd.s32 1, %s521_s15   ;;  %s91_s19 = sadd.s32 1, %s517_s14 }
   0x5   : > { %s88_s20 = ssub.s32 %s521_s15, %s570_s18  ;;  %p101_p0 = scmp.ne.s32.totalorder %s517_s14, %s513_s13 }
   0x6   : > { %p89_p1 = scmp.eq.s32.totalorder %s88_s20, 0  ;;  %p102_p2 = scmp.eq.s32.totalorder %s566_s16, 1 }
   0x7   : > { %p107_p3 = scmp.ne.s32.totalorder %s513_s13, %s509_s12  ;;  %p108_p4 = scmp.eq.s32.totalorder %s349_s17, 1 }
   0x8   : > { %s581_s21 = scalar_select %p89_p1, %s517_s14, %s91_s19  }
   0x9   : > { %p583_p5 = por %p102_p2, %p101_p0  ;;  %p587_p6 = por %p108_p4, %p107_p3 }
   0xa   : > { %p352_p7 = scmp.ge.s32.totalorder %s521_s15, 1  ;;  %p141_p8 = scmp.lt.s32.totalorder %s521_s15, 3 }
   0xc   : > { %p142_p9 = pnand %p352_p7, %p141_p8 }
   0xd   : > { %s354_s26 = sshll.u32 (!%p142_p9), %s566_s16, 3  ;;  %s162_s4 = sand.u32 (!%p142_p9), 1, %s513_s13  }
   0xe   : > { %145 = sbr.rel (%p142_p9) target bundleno = 173 (0xad), region = 32  ;;  %p166_p10 = scmp.lt.s32.totalorder (!%p142_p9), %s354_s26, 15 }
   0xf   : > { %s353_s7 = sshll.u32 (!%p142_p9), %s162_s4, 5  ;;  %s390_s8 = sshll.u32 (!%p142_p9), %s566_s16, 5 }
  0x10   : > { %s283_s11 = scalar_lea.hbm (!%p142_p9), %s642_s3, %s390_s8  ;;  %s164_s17 = scalar_lea.vmem (!%p142_p9), [#allocation2], %s353_s7 }
  0x11   : > { %s284_s19 = sshll.u32 (!%p142_p9), %s164_s17, 4  ;;  %s286_s20 = sshll.u32 (!%p142_p9), %s283_s11, 4  ;;  %s285_s19 = int_to_ptr.vmem [resolvable:$true] %s284_s19  ;;  %s287_s20 = int_to_ptr.hbm [resolvable:$true] %s286_s20 }
  0x12   : > { %s272_s16 = scalar_lea.sflag (!%p142_p9), [#allocation3], %s162_s4  ;;  %s473_s24 = sshra.s32 (!%p142_p9), %s287_s20, 4  ;;  %s474_s24 = int_to_ptr.hbm [resolvable:$true] %s473_s24 }
  0x13   : > { %v389_v0 = vld [vmem:[%s640_s1] sm:$0xff]  ;;  %s650_s26 = smov (!%p166_p10, %s354_s26), 15  ;;  %vm213_vm0 = vcmask 130048   ;;  %s475_s25 = scalar_lea.hbm %s474_s24, 32 }
  0x14   : > { %233 = vmatpush.bf16.msra.mxu0 %v389_v0  ;;  %414 = vmatpush.bf16.msra.mxu1 %v389_v0  ;;  %s355_s27 = sshll.u32 %s650_s26, 2  ;;  %v458_v7 = vld [vmem:[%s641_s2] ss:$0 sm:$0xff]  ;;  %p476_p11 = scmp.ne.s32.totalorder %s474_s24, %s475_s25 }
  0x15   : > { %415 = vmatpush.bf16.msra.mxu2 %v389_v0  ;;  %416 = vmatpush.bf16.msra.mxu3 %v389_v0  ;;  %s169_s30 = scalar_lea.vmem %s639_s0, %s355_s27  ;;  %s479_s28 = scalar_lea.hbm %s642_s3, 64 }
  0x16   : > { %v385_v1 = vld [vmem:[%s169_s30] sm:$0xff]  ;;  %v386_v2 = vld [vmem:[%s169_s30 + $0x8] sm:$0xff]  ;;  %v387_v3 = vld [vmem:[%s169_s30 + $0x10] sm:$0xff]  ;;  %p477_p12 = pnand %p476_p11, %p583_p5  ;;  %p480_p0 = scmp.lt.s32.totalorder %s474_s24, %s642_s3 }
  0x17   : > { %v388_v4 = vld [vmem:[%s169_s30 + $0x18] sm:$0xff]  ;;  %376 = vmatmul.msk.bf16.vlgmr.msra.gmra.mxu0 %vm213_vm0, %v385_v1  ;;  %377 = vmatmul.msk.bf16.vlgmr.msra.gmra.mxu1 %vm213_vm0, %v386_v2  ;;  %p481_p1 = scmp.lt.s32.totalorder %s479_s28, %s475_s25 }
  0x18   : > { %378 = vmatmul.msk.bf16.vlgmr.msra.gmra.mxu2 %vm213_vm0, %v387_v3  ;;  %379 = vmatmul.msk.bf16.vlgmr.msra.gmra.mxu3 %vm213_vm0, %v388_v4  ;;  %p478_p13 = pneg %p477_p12 }
  0x19   : > { %p482_p2 = por %p481_p1, %p480_p0 }
  0x1b   : > { %p483_p3 = pnand %p482_p2, %p478_p13 }
  0x94   : > { %v235_v5 = vpop.f32.mrf.mxu0  ;;  %v240_v6 = vpop.f32.mrf.mxu1 }
  0x95   : > { %v236_v12 = vadd.f32 %v458_v7, %v235_v5  ;;  %v241_v13 = vadd.f32 %v458_v7, %v240_v6 }
  0x9b   : > { %v245_v8 = vpop.f32.mrf.mxu2  ;;  %v250_v9 = vpop.f32.mrf.mxu3 }
  0x9c   : > { %v237_v10 = vpop.f32.mrf.mxu0  ;;  %v242_v11 = vpop.f32.mrf.mxu1  ;;  %v246_v20 = vadd.f32 %v458_v7, %v245_v8  ;;  %v251_v21 = vadd.f32 %v458_v7, %v250_v9 }
  0x9d   : > { %v238_v14 = vadd.f32 %v458_v7, %v237_v10  ;;  %v243_v15 = vadd.f32 %v458_v7, %v242_v11 }
  0x9f   : > { %v394_v16 = vpack.c.bf16 %v238_v14, %v236_v12  ;;  %v399_v17 = vpack.c.bf16 %v243_v15, %v241_v13 }
  0xa1   : > { %395 = vst [vmem:[%s164_s17] sm:$0xff] %v394_v16  }
  0xa2   : > { %411 = vst [vmem:[%s164_s17 + $0x8] sm:$0xff] %v399_v17  }
  0xa3   : > { %v247_v18 = vpop.f32.mrf.mxu2  ;;  %v252_v19 = vpop.f32.mrf.mxu3 }
  0xa4   : > { %v248_v22 = vadd.f32 %v458_v7, %v247_v18  ;;  %v253_v23 = vadd.f32 %v458_v7, %v252_v19 }
  0xa6   : > { %v404_v24 = vpack.c.bf16 %v248_v22, %v246_v20  ;;  %v409_v25 = vpack.c.bf16 %v253_v23, %v251_v21 }
  0xa8   : > { %412 = vst [vmem:[%s164_s17 + $0x10] sm:$0xff] %v404_v24  }
  0xa9   : > { %413 = vst [vmem:[%s164_s17 + $0x18] sm:$0xff] %v409_v25  }
  0xaa   : > { %486 = shalt.err (!%p483_p3)
}
  0xab   : > { %s523_s4 = smov 64   ;;  %s524_s5 = smov 4  }
  0xac   : > { %417 = dma.vmem_to_hbm [thread:$0]  (%p583_p5), %s285_s19, 512, %s287_s20, %s272_s16, %s523_s4, %s523_s4, %s524_s5  }
  0xad PF: > { %p423_p4 = scmp.ge.s32.totalorder %s521_s15, 2  ;;  %s301_s6 = sand.u32 1, %s509_s12  }
  0xae   : > { %s302_s7 = scalar_lea.sflag [#allocation3], %s301_s6 }
  0xaf   : > { %p420_p7 = pnand %p423_p4, %p587_p6 }
  0xb1   : > { %p421_p8 = pneg %p420_p7 }
  0xb3   : > { %504 = dma.done.wait (%p421_p8), %s302_s7, 512  }
  0xb4   : > { %506 = vsyncadd (%p421_p8), %s302_s7, 4294966784  ;;  %p13_p9 = scmp.ge.s32.totalorder %s570_s18, 4   ;;  %s645_s12 = smov %s513_s13 }
  0xb5   : > { %s646_s13 = smov %s517_s14  ;;  %s647_s14 = smov %s581_s21 }
  0xb6   : > { %s648_s15 = smov %s570_s18  ;;  %15 = sbr.rel (!%p13_p9) target bundleno = 3 (0x3), region = 67 }
  0xbb   :  { %308 = vsyncpa [#allocation3], 1 }
  0xbc   :  { %310 = vsyncpa [#allocation3 + $0x1], 1 }

</bundles_post_ra>
